<compile_context>
chip_gen: v7x
topology: tpu7x:2x2x1
jax: 0.10.0
libtpu: 0.0.40
codegen_flags: <defaults>
</compile_context>

<pallas_src>
import functools
import math

import jax
import jax.numpy as jnp
from jax import lax
from jax.experimental import pallas as pl
from jax.experimental.pallas import tpu as pltpu


# -----------------------------------------------------------------------------
# Pallas kernel: one block of Bb sequences per grid step.
# -----------------------------------------------------------------------------
def transformer_kernel(x_ref, pe_ref, wa_ref, ba_ref, w2_ref, vec_ref, out_ref,
                       *, embed_dim, hidden_dim, out_pad, block_b, seq_len):
    E, H, S, Bb = embed_dim, hidden_dim, seq_len, block_b
    M = Bb * S

    # x is already scaled by E (folded into embedding/feature weights).
    # Positional encoding add (dropout identity at inference).
    x = x_ref[...].astype(jnp.float32) + pe_ref[...][None, :, :]     # [Bb, S, E]
    x = x.reshape(M, E)                                              # [M, E]

    ln = vec_ref[...].astype(jnp.float32)                            # [8, E]

    def layer_norm(v, w, b):
        mu = jnp.mean(v, axis=-1, keepdims=True)
        var = jnp.mean((v - mu) ** 2, axis=-1, keepdims=True)
        return (v - mu) * lax.rsqrt(var + 1e-5) * w + b

    # self.layer_norm applied before the encoder.
    src = layer_norm(x, ln[0:1], ln[1:2])

    # ---- single-head self-attention (nn.MultiheadAttention, nhead=1) --------
    qkv = (jnp.dot(src.astype(jnp.bfloat16), wa_ref[:, :3 * E],
                   preferred_element_type=jnp.float32)
           + ba_ref[:, :3 * E].astype(jnp.float32))                  # [M, 3E]
    q = qkv[:, :E].reshape(Bb, S, E)          # Q pre-scaled by 1/sqrt(E)
    k = qkv[:, E:2 * E].reshape(Bb, S, E)
    v = qkv[:, 2 * E:].reshape(Bb, S, E)

    scores = jnp.einsum('bqd,bkd->bqk',
                        q.astype(jnp.bfloat16), k.astype(jnp.bfloat16),
                        preferred_element_type=jnp.float32)          # [Bb, S, S]
    scores = scores - jnp.max(scores, axis=-1, keepdims=True)
    p = jnp.exp(scores)
    attn = p * pl.reciprocal(jnp.sum(p, axis=-1, keepdims=True), approx=True)
    ctx = jnp.einsum('bqk,bkd->bqd',
                     attn.astype(jnp.bfloat16), v.astype(jnp.bfloat16),
                     preferred_element_type=jnp.float32).reshape(M, E)
    attn_out = (jnp.dot(ctx.astype(jnp.bfloat16), wa_ref[:, 3 * E:4 * E],
                        preferred_element_type=jnp.float32)
                + ba_ref[:, 3 * E:4 * E].astype(jnp.float32))

    # post-norm TransformerEncoderLayer: residual + norm1
    src = layer_norm(src + attn_out, ln[2:3], ln[3:4])

    # ---- feed-forward: linear1 -> relu -> linear2 -> residual + norm2 -------
    h = jnp.maximum(
        jnp.dot(src.astype(jnp.bfloat16), wa_ref[:, 4 * E:4 * E + H],
                preferred_element_type=jnp.float32)
        + ba_ref[:, 4 * E:4 * E + H].astype(jnp.float32), 0.0)
    ffn = (jnp.dot(h.astype(jnp.bfloat16), w2_ref[...],
                   preferred_element_type=jnp.float32)
           + ln[6:7])                                                # b2
    src = layer_norm(src + ffn, ln[4:5], ln[5:6])

    # ---- output head: LeakyReLU(0.01) -> Linear(E, 12) (lane-padded to 128) --
    y = jnp.where(src > 0, src, jnp.float32(0.01) * src)
    out = (jnp.dot(y.astype(jnp.bfloat16), wa_ref[:, 4 * E + H:],
                   preferred_element_type=jnp.float32)
           + ba_ref[:, 4 * E + H:].astype(jnp.float32))              # [M, out_pad]
    out_ref[...] = out.reshape(Bb, S, out_pad).astype(out_ref.dtype)


# -----------------------------------------------------------------------------
# Parameter construction (deterministic, synthetic) with scale folding/packing.
# -----------------------------------------------------------------------------
def make_positional_encoding(max_len, d_model):
    position = jnp.arange(max_len, dtype=jnp.float32)[:, None]
    div_term = jnp.exp(jnp.arange(0, d_model, 2, dtype=jnp.float32)
                       * (-math.log(10000.0) / d_model))
    pe = jnp.zeros((max_len, d_model), jnp.float32)
    pe = pe.at[:, 0::2].set(jnp.sin(position * div_term))
    pe = pe.at[:, 1::2].set(jnp.cos(position * div_term))
    return pe


def init_params(key, ntoken, embed_dim, hidden_dim, out_dim, max_len, out_pad=128):
    std = 0.02
    E, H = embed_dim, hidden_dim
    ks = jax.random.split(key, 8)

    # -- embedding path; fold the double sqrt(E) scale (i.e. * E) in here -----
    scale_e = float(E)
    emb = jax.random.normal(ks[0], (ntoken, E - 64), jnp.float32) * std
    emb = emb.at[0].set(0.0)                                 # padding_idx = 0
    emb = emb * scale_e
    w_feat = jax.random.normal(ks[1], (1, 64), jnp.float32) * std * scale_e
    b_feat = jnp.zeros((64,), jnp.float32) * scale_e

    # -- attention / FFN / head weights (stored transposed: [in, out]) --------
    wqkv = jax.random.normal(ks[2], (E, 3 * E), jnp.float32) * std
    bqkv = jnp.zeros((3 * E,), jnp.float32)
    q_scale = 1.0 / math.sqrt(E)                 # head_dim == E (1 head); fold into Q
    wqkv = wqkv.at[:, :E].multiply(q_scale)
    bqkv = bqkv.at[:E].multiply(q_scale)

    wo = jax.random.normal(ks[3], (E, E), jnp.float32) * std
    bo = jnp.zeros((E,), jnp.float32)
    w1 = jax.random.normal(ks[4], (E, H), jnp.float32) * std
    b1 = jnp.zeros((H,), jnp.float32)
    w2 = jax.random.normal(ks[5], (H, E), jnp.float32) * std
    b2 = jnp.zeros((E,), jnp.float32)
    wout = jax.random.normal(ks[6], (E, out_dim), jnp.float32) * std
    bout = jnp.zeros((out_dim,), jnp.float32)

    # lane-pad the 12-wide head to out_pad columns (lane-dense output stores)
    wout_p = jnp.zeros((E, out_pad), jnp.float32).at[:, :out_dim].set(wout)
    bout_p = jnp.zeros((out_pad,), jnp.float32).at[:out_dim].set(bout)

    # -- packed slabs ----------------------------------------------------------
    w_slab = jnp.concatenate([wqkv, wo, w1, wout_p], axis=1).astype(jnp.bfloat16)
    b_slab = jnp.concatenate([bqkv, bo, b1, bout_p])[None, :]        # [1, 4E+H+out_pad]
    vec_slab = jnp.stack([
        jnp.ones((E,), jnp.float32), jnp.zeros((E,), jnp.float32),   # ln0 w/b
        jnp.ones((E,), jnp.float32), jnp.zeros((E,), jnp.float32),   # ln1 w/b
        jnp.ones((E,), jnp.float32), jnp.zeros((E,), jnp.float32),   # ln2 w/b
        b2, jnp.zeros((E,), jnp.float32),                            # b2, pad row
    ])                                                               # [8, E]

    return dict(
        embedding=emb, w_feat=w_feat, b_feat=b_feat,
        pe=make_positional_encoding(max_len, E),
        w_slab=w_slab, b_slab=b_slab,
        w2=w2.astype(jnp.bfloat16), vec_slab=vec_slab,
    )


# -----------------------------------------------------------------------------
# Wrapper: glue (embedding gather, feature linear, concat) + pallas_call.
# -----------------------------------------------------------------------------
def transformer_forward(x1, x2, params, *, embed_dim, hidden_dim, out_dim,
                        out_pad=128):
    B, S = x1.shape
    E, H = embed_dim, hidden_dim
    Wtot = 4 * E + H + out_pad

    # Glue: token embedding + feature embedding (Linear(1, 64)) + concat.
    # (scale-by-E already folded into these parameters)
    emb = params["embedding"][x1]                           # [B, S, E-64]
    feat = x2 @ params["w_feat"] + params["b_feat"]         # [B, S, 64]
    x = jnp.concatenate([emb, feat], axis=-1)               # [B, S, E]
    pe = params["pe"][:S]                                   # [S, E]

    # Batch-block so each grid step feeds the MXU M = Bb*S rows (target ~256).
    Bb = max(1, min(B, pl.cdiv(256, S)))
    Bp = pl.cdiv(B, Bb) * Bb
    if Bp != B:
        x = jnp.pad(x, ((0, Bp - B), (0, 0), (0, 0)))
    grid = (Bp // Bb,)

    kernel = functools.partial(transformer_kernel, embed_dim=E, hidden_dim=H,
                               out_pad=out_pad, block_b=Bb, seq_len=S)
    out = pl.pallas_call(
        kernel,
        out_shape=jax.ShapeDtypeStruct((Bp, S, out_pad), jnp.float32),
        grid=grid,
        in_specs=[
            pl.BlockSpec((Bb, S, E), lambda g: (g, 0, 0)),   # activations
            pl.BlockSpec((S, E), lambda g: (0, 0)),          # positional enc
            pl.BlockSpec((E, Wtot), lambda g: (0, 0)),        # weight slab (bf16)
            pl.BlockSpec((1, Wtot), lambda g: (0, 0)),        # bias slab (f32)
            pl.BlockSpec((H, E), lambda g: (0, 0)),           # w2 (bf16)
            pl.BlockSpec((8, E), lambda g: (0, 0)),           # LN params + b2
        ],
        out_specs=pl.BlockSpec((Bb, S, out_pad), lambda g: (g, 0, 0)),
        compiler_params=pltpu.CompilerParams(
            dimension_semantics=("parallel",)),
    )(x, pe, params["w_slab"], params["b_slab"], params["w2"],
      params["vec_slab"])

    # Slice back to the real batch and the 12-wide head.
    return out[:B, :, :out_dim]


if __name__ == "__main__":
    ntoken = 30
    embed_dim = 128        # token embedding dim = embed_dim - 64 = 64
    hidden_dim = 256
    out_dim = 12           # non-prosit head: Linear(embed_dim, 12)
    max_len = 100
    B, S = 2, 8

    key = jax.random.PRNGKey(0)
    k_tok, k_feat, k_par = jax.random.split(key, 3)
    x1 = jax.random.randint(k_tok, (B, S), 1, ntoken)                # token ids
    x2 = jax.random.normal(k_feat, (B, S, 1), dtype=jnp.float32)     # scalar feature

    params = init_params(k_par, ntoken, embed_dim, hidden_dim, out_dim, max_len)

    out = transformer_forward(x1, x2, params, embed_dim=embed_dim,
                              hidden_dim=hidden_dim, out_dim=out_dim)
    out = jax.block_until_ready(out)
    assert out.shape == (B, S, out_dim)
    assert bool(jnp.all(jnp.isfinite(out)))
    print("KERNEL_OK")
</pallas_src>

<mosaic_0001>
module attributes {stable_mosaic.version = 11 : i64} {
  func.func @transformer_kernel(%arg0: i32, %arg1: memref<2x8x128xf32, #tpu.memory_space<vmem>>, %arg2: memref<8x128xf32, #tpu.memory_space<vmem>>, %arg3: memref<128x896xbf16, #tpu.memory_space<vmem>>, %arg4: memref<1x896xf32, #tpu.memory_space<vmem>>, %arg5: memref<256x128xbf16, #tpu.memory_space<vmem>>, %arg6: memref<8x128xf32, #tpu.memory_space<vmem>>, %arg7: memref<2x8x128xf32, #tpu.memory_space<vmem>>) attributes {dimension_semantics = [#tpu.dimension_semantics<parallel>], iteration_bounds = array<i64: 1>, scalar_prefetch = 0 : i64, scratch_operands = 0 : i64, tpu.core_type = #tpu.core_type<tc>, window_params = [{transform_indices = @transform_0, window_bounds = array<i64: 2, 8, 128>}, {pipeline_mode = #tpu.pipeline_mode<synchronous>, transform_indices = @transform_1, window_bounds = array<i64: 8, 128>}, {pipeline_mode = #tpu.pipeline_mode<synchronous>, transform_indices = @transform_2, window_bounds = array<i64: 128, 896>}, {pipeline_mode = #tpu.pipeline_mode<synchronous>, transform_indices = @transform_3, window_bounds = array<i64: 1, 896>}, {pipeline_mode = #tpu.pipeline_mode<synchronous>, transform_indices = @transform_4, window_bounds = array<i64: 256, 128>}, {pipeline_mode = #tpu.pipeline_mode<synchronous>, transform_indices = @transform_5, window_bounds = array<i64: 8, 128>}, {transform_indices = @transform_6, window_bounds = array<i64: 2, 8, 128>}]} {
    %c0 = arith.constant 0 : index
    %c0_0 = arith.constant 0 : index
    %c0_1 = arith.constant 0 : index
    %0 = vector.load %arg1[%c0, %c0_0, %c0_1] : memref<2x8x128xf32, #tpu.memory_space<vmem>>, vector<2x8x128xf32>
    %c0_2 = arith.constant 0 : index
    %c0_3 = arith.constant 0 : index
    %1 = vector.load %arg2[%c0_2, %c0_3] : memref<8x128xf32, #tpu.memory_space<vmem>>, vector<8x128xf32>
    %2 = vector.shape_cast %1 : vector<8x128xf32> to vector<1x8x128xf32>
    %3 = vector.broadcast %2 : vector<1x8x128xf32> to vector<2x8x128xf32>
    %4 = arith.addf %0, %3 : vector<2x8x128xf32>
    %5 = vector.shape_cast %4 : vector<2x8x128xf32> to vector<16x128xf32>
    %c0_4 = arith.constant 0 : index
    %c0_5 = arith.constant 0 : index
    %6 = vector.load %arg6[%c0_4, %c0_5] : memref<8x128xf32, #tpu.memory_space<vmem>>, vector<8x128xf32>
    %7 = vector.extract_strided_slice %6 {offsets = [0, 0], sizes = [1, 128], strides = [1, 1]} : vector<8x128xf32> to vector<1x128xf32>
    %8 = vector.extract_strided_slice %6 {offsets = [1, 0], sizes = [1, 128], strides = [1, 1]} : vector<8x128xf32> to vector<1x128xf32>
    %cst = arith.constant dense<0.000000e+00> : vector<16xf32>
    %9 = vector.multi_reduction <add>, %5, %cst [1] : vector<16x128xf32> to vector<16xf32>
    %10 = vector.shape_cast %9 : vector<16xf32> to vector<16x1xf32>
    %cst_6 = arith.constant 1.280000e+02 : f32
    %11 = vector.broadcast %cst_6 : f32 to vector<16x1xf32>
    %12 = arith.divf %10, %11 : vector<16x1xf32>
    %13 = vector.broadcast %12 : vector<16x1xf32> to vector<16x128xf32>
    %14 = arith.subf %5, %13 : vector<16x128xf32>
    %15 = arith.mulf %14, %14 : vector<16x128xf32>
    %cst_7 = arith.constant dense<0.000000e+00> : vector<16xf32>
    %16 = vector.multi_reduction <add>, %15, %cst_7 [1] : vector<16x128xf32> to vector<16xf32>
    %17 = vector.shape_cast %16 : vector<16xf32> to vector<16x1xf32>
    %cst_8 = arith.constant 1.280000e+02 : f32
    %18 = vector.broadcast %cst_8 : f32 to vector<16x1xf32>
    %19 = arith.divf %17, %18 : vector<16x1xf32>
    %20 = vector.broadcast %12 : vector<16x1xf32> to vector<16x128xf32>
    %21 = arith.subf %5, %20 : vector<16x128xf32>
    %cst_9 = arith.constant 9.99999974E-6 : f32
    %22 = vector.broadcast %cst_9 : f32 to vector<16x1xf32>
    %23 = arith.addf %19, %22 : vector<16x1xf32>
    %24 = math.rsqrt %23 : vector<16x1xf32>
    %25 = vector.broadcast %24 : vector<16x1xf32> to vector<16x128xf32>
    %26 = arith.mulf %21, %25 : vector<16x128xf32>
    %27 = vector.broadcast %7 : vector<1x128xf32> to vector<16x128xf32>
    %28 = arith.mulf %26, %27 : vector<16x128xf32>
    %29 = vector.broadcast %8 : vector<1x128xf32> to vector<16x128xf32>
    %30 = arith.addf %28, %29 : vector<16x128xf32>
    %31 = arith.truncf %30 : vector<16x128xf32> to vector<16x128xbf16>
    %c0_10 = arith.constant 0 : index
    %c0_11 = arith.constant 0 : index
    %32 = vector.load %arg3[%c0_10, %c0_11] : memref<128x896xbf16, #tpu.memory_space<vmem>>, vector<128x384xbf16>
    %cst_12 = arith.constant dense<0.000000e+00> : vector<16x384xf32>
    %33 = tpu.matmul %31, %32, %cst_12 {dimension_numbers = #tpu.dot_dimension_numbers<[1], [0], [0], [1], [0, 0, 1, 1], [], []>} : vector<16x128xbf16>, vector<128x384xbf16>, vector<16x384xf32> -> vector<16x384xf32>
    %c0_13 = arith.constant 0 : index
    %c0_14 = arith.constant 0 : index
    %34 = vector.load %arg4[%c0_13, %c0_14] : memref<1x896xf32, #tpu.memory_space<vmem>>, vector<1x384xf32>
    %35 = vector.broadcast %34 : vector<1x384xf32> to vector<16x384xf32>
    %36 = arith.addf %33, %35 : vector<16x384xf32>
    %37 = vector.extract_strided_slice %36 {offsets = [0, 0], sizes = [16, 128], strides = [1, 1]} : vector<16x384xf32> to vector<16x128xf32>
    %38 = vector.shape_cast %37 : vector<16x128xf32> to vector<2x8x128xf32>
    %39 = vector.extract_strided_slice %36 {offsets = [0, 128], sizes = [16, 128], strides = [1, 1]} : vector<16x384xf32> to vector<16x128xf32>
    %40 = vector.shape_cast %39 : vector<16x128xf32> to vector<2x8x128xf32>
    %41 = vector.extract_strided_slice %36 {offsets = [0, 256], sizes = [16, 128], strides = [1, 1]} : vector<16x384xf32> to vector<16x128xf32>
    %42 = vector.shape_cast %41 : vector<16x128xf32> to vector<2x8x128xf32>
    %43 = arith.truncf %38 : vector<2x8x128xf32> to vector<2x8x128xbf16>
    %44 = arith.truncf %40 : vector<2x8x128xf32> to vector<2x8x128xbf16>
    "tpu.trace_start"() <{level = 10 : i32, message = "bqd,bkd->bqk"}> : () -> ()
    %cst_15 = arith.constant dense<0.000000e+00> : vector<2x8x8xf32>
    %45 = tpu.matmul %43, %44, %cst_15 {dimension_numbers = #tpu.dot_dimension_numbers<[2], [2], [1], [1], [0, 0, 0, 1, 1, 1], [0], [0]>} : vector<2x8x128xbf16>, vector<2x8x128xbf16>, vector<2x8x8xf32> -> vector<2x8x8xf32>
    "tpu.trace_stop"() : () -> ()
    %cst_16 = arith.constant dense<0xFF800000> : vector<2x8xf32>
    %46 = vector.multi_reduction <maximumf>, %45, %cst_16 [2] : vector<2x8x8xf32> to vector<2x8xf32>
    %47 = vector.shape_cast %46 : vector<2x8xf32> to vector<2x8x1xf32>
    %48 = vector.broadcast %47 : vector<2x8x1xf32> to vector<2x8x8xf32>
    %49 = arith.subf %45, %48 : vector<2x8x8xf32>
    %50 = math.exp %49 : vector<2x8x8xf32>
    %cst_17 = arith.constant dense<0.000000e+00> : vector<2x8xf32>
    %51 = vector.multi_reduction <add>, %50, %cst_17 [2] : vector<2x8x8xf32> to vector<2x8xf32>
    %52 = vector.shape_cast %51 : vector<2x8xf32> to vector<2x8x1xf32>
    %53 = tpu.reciprocal %52 {approx = true} : vector<2x8x1xf32> -> vector<2x8x1xf32>
    %54 = vector.broadcast %53 : vector<2x8x1xf32> to vector<2x8x8xf32>
    %55 = arith.mulf %50, %54 : vector<2x8x8xf32>
    %56 = arith.truncf %55 : vector<2x8x8xf32> to vector<2x8x8xbf16>
    %57 = arith.truncf %42 : vector<2x8x128xf32> to vector<2x8x128xbf16>
    "tpu.trace_start"() <{level = 10 : i32, message = "bqk,bkd->bqd"}> : () -> ()
    %cst_18 = arith.constant dense<0.000000e+00> : vector<2x8x128xf32>
    %58 = tpu.matmul %56, %57, %cst_18 {dimension_numbers = #tpu.dot_dimension_numbers<[2], [1], [1], [2], [0, 0, 0, 1, 1, 2], [0], [0]>} : vector<2x8x8xbf16>, vector<2x8x128xbf16>, vector<2x8x128xf32> -> vector<2x8x128xf32>
    "tpu.trace_stop"() : () -> ()
    %59 = vector.shape_cast %58 : vector<2x8x128xf32> to vector<16x128xf32>
    %60 = arith.truncf %59 : vector<16x128xf32> to vector<16x128xbf16>
    %c0_19 = arith.constant 0 : index
    %c384 = arith.constant 384 : index
    %61 = vector.load %arg3[%c0_19, %c384] : memref<128x896xbf16, #tpu.memory_space<vmem>>, vector<128x128xbf16>
    %cst_20 = arith.constant dense<0.000000e+00> : vector<16x128xf32>
    %62 = tpu.matmul %60, %61, %cst_20 {dimension_numbers = #tpu.dot_dimension_numbers<[1], [0], [0], [1], [0, 0, 1, 1], [], []>} : vector<16x128xbf16>, vector<128x128xbf16>, vector<16x128xf32> -> vector<16x128xf32>
    %c0_21 = arith.constant 0 : index
    %c384_22 = arith.constant 384 : index
    %63 = vector.load %arg4[%c0_21, %c384_22] : memref<1x896xf32, #tpu.memory_space<vmem>>, vector<1x128xf32>
    %64 = vector.broadcast %63 : vector<1x128xf32> to vector<16x128xf32>
    %65 = arith.addf %62, %64 : vector<16x128xf32>
    %66 = arith.addf %30, %65 : vector<16x128xf32>
    %67 = vector.extract_strided_slice %6 {offsets = [2, 0], sizes = [1, 128], strides = [1, 1]} : vector<8x128xf32> to vector<1x128xf32>
    %68 = vector.extract_strided_slice %6 {offsets = [3, 0], sizes = [1, 128], strides = [1, 1]} : vector<8x128xf32> to vector<1x128xf32>
    %cst_23 = arith.constant dense<0.000000e+00> : vector<16xf32>
    %69 = vector.multi_reduction <add>, %66, %cst_23 [1] : vector<16x128xf32> to vector<16xf32>
    %70 = vector.shape_cast %69 : vector<16xf32> to vector<16x1xf32>
    %cst_24 = arith.constant 1.280000e+02 : f32
    %71 = vector.broadcast %cst_24 : f32 to vector<16x1xf32>
    %72 = arith.divf %70, %71 : vector<16x1xf32>
    %73 = vector.broadcast %72 : vector<16x1xf32> to vector<16x128xf32>
    %74 = arith.subf %66, %73 : vector<16x128xf32>
    %75 = arith.mulf %74, %74 : vector<16x128xf32>
    %cst_25 = arith.constant dense<0.000000e+00> : vector<16xf32>
    %76 = vector.multi_reduction <add>, %75, %cst_25 [1] : vector<16x128xf32> to vector<16xf32>
    %77 = vector.shape_cast %76 : vector<16xf32> to vector<16x1xf32>
    %cst_26 = arith.constant 1.280000e+02 : f32
    %78 = vector.broadcast %cst_26 : f32 to vector<16x1xf32>
    %79 = arith.divf %77, %78 : vector<16x1xf32>
    %80 = vector.broadcast %72 : vector<16x1xf32> to vector<16x128xf32>
    %81 = arith.subf %66, %80 : vector<16x128xf32>
    %cst_27 = arith.constant 9.99999974E-6 : f32
    %82 = vector.broadcast %cst_27 : f32 to vector<16x1xf32>
    %83 = arith.addf %79, %82 : vector<16x1xf32>
    %84 = math.rsqrt %83 : vector<16x1xf32>
    %85 = vector.broadcast %84 : vector<16x1xf32> to vector<16x128xf32>
    %86 = arith.mulf %81, %85 : vector<16x128xf32>
    %87 = vector.broadcast %67 : vector<1x128xf32> to vector<16x128xf32>
    %88 = arith.mulf %86, %87 : vector<16x128xf32>
    %89 = vector.broadcast %68 : vector<1x128xf32> to vector<16x128xf32>
    %90 = arith.addf %88, %89 : vector<16x128xf32>
    %91 = arith.truncf %90 : vector<16x128xf32> to vector<16x128xbf16>
    %c0_28 = arith.constant 0 : index
    %c512 = arith.constant 512 : index
    %92 = vector.load %arg3[%c0_28, %c512] : memref<128x896xbf16, #tpu.memory_space<vmem>>, vector<128x256xbf16>
    %cst_29 = arith.constant dense<0.000000e+00> : vector<16x256xf32>
    %93 = tpu.matmul %91, %92, %cst_29 {dimension_numbers = #tpu.dot_dimension_numbers<[1], [0], [0], [1], [0, 0, 1, 1], [], []>} : vector<16x128xbf16>, vector<128x256xbf16>, vector<16x256xf32> -> vector<16x256xf32>
    %c0_30 = arith.constant 0 : index
    %c512_31 = arith.constant 512 : index
    %94 = vector.load %arg4[%c0_30, %c512_31] : memref<1x896xf32, #tpu.memory_space<vmem>>, vector<1x256xf32>
    %95 = vector.broadcast %94 : vector<1x256xf32> to vector<16x256xf32>
    %96 = arith.addf %93, %95 : vector<16x256xf32>
    %cst_32 = arith.constant 0.000000e+00 : f32
    %97 = vector.broadcast %cst_32 : f32 to vector<16x256xf32>
    %98 = arith.maximumf %96, %97 : vector<16x256xf32>
    %99 = arith.truncf %98 : vector<16x256xf32> to vector<16x256xbf16>
    %c0_33 = arith.constant 0 : index
    %c0_34 = arith.constant 0 : index
    %100 = vector.load %arg5[%c0_33, %c0_34] : memref<256x128xbf16, #tpu.memory_space<vmem>>, vector<256x128xbf16>
    %cst_35 = arith.constant dense<0.000000e+00> : vector<16x128xf32>
    %101 = tpu.matmul %99, %100, %cst_35 {dimension_numbers = #tpu.dot_dimension_numbers<[1], [0], [0], [1], [0, 0, 1, 1], [], []>} : vector<16x256xbf16>, vector<256x128xbf16>, vector<16x128xf32> -> vector<16x128xf32>
    %102 = vector.extract_strided_slice %6 {offsets = [6, 0], sizes = [1, 128], strides = [1, 1]} : vector<8x128xf32> to vector<1x128xf32>
    %103 = vector.broadcast %102 : vector<1x128xf32> to vector<16x128xf32>
    %104 = arith.addf %101, %103 : vector<16x128xf32>
    %105 = arith.addf %90, %104 : vector<16x128xf32>
    %106 = vector.extract_strided_slice %6 {offsets = [4, 0], sizes = [1, 128], strides = [1, 1]} : vector<8x128xf32> to vector<1x128xf32>
    %107 = vector.extract_strided_slice %6 {offsets = [5, 0], sizes = [1, 128], strides = [1, 1]} : vector<8x128xf32> to vector<1x128xf32>
    %cst_36 = arith.constant dense<0.000000e+00> : vector<16xf32>
    %108 = vector.multi_reduction <add>, %105, %cst_36 [1] : vector<16x128xf32> to vector<16xf32>
    %109 = vector.shape_cast %108 : vector<16xf32> to vector<16x1xf32>
    %cst_37 = arith.constant 1.280000e+02 : f32
    %110 = vector.broadcast %cst_37 : f32 to vector<16x1xf32>
    %111 = arith.divf %109, %110 : vector<16x1xf32>
    %112 = vector.broadcast %111 : vector<16x1xf32> to vector<16x128xf32>
    %113 = arith.subf %105, %112 : vector<16x128xf32>
    %114 = arith.mulf %113, %113 : vector<16x128xf32>
    %cst_38 = arith.constant dense<0.000000e+00> : vector<16xf32>
    %115 = vector.multi_reduction <add>, %114, %cst_38 [1] : vector<16x128xf32> to vector<16xf32>
    %116 = vector.shape_cast %115 : vector<16xf32> to vector<16x1xf32>
    %cst_39 = arith.constant 1.280000e+02 : f32
    %117 = vector.broadcast %cst_39 : f32 to vector<16x1xf32>
    %118 = arith.divf %116, %117 : vector<16x1xf32>
    %119 = vector.broadcast %111 : vector<16x1xf32> to vector<16x128xf32>
    %120 = arith.subf %105, %119 : vector<16x128xf32>
    %cst_40 = arith.constant 9.99999974E-6 : f32
    %121 = vector.broadcast %cst_40 : f32 to vector<16x1xf32>
    %122 = arith.addf %118, %121 : vector<16x1xf32>
    %123 = math.rsqrt %122 : vector<16x1xf32>
    %124 = vector.broadcast %123 : vector<16x1xf32> to vector<16x128xf32>
    %125 = arith.mulf %120, %124 : vector<16x128xf32>
    %126 = vector.broadcast %106 : vector<1x128xf32> to vector<16x128xf32>
    %127 = arith.mulf %125, %126 : vector<16x128xf32>
    %128 = vector.broadcast %107 : vector<1x128xf32> to vector<16x128xf32>
    %129 = arith.addf %127, %128 : vector<16x128xf32>
    %cst_41 = arith.constant 0.000000e+00 : f32
    %130 = vector.broadcast %cst_41 : f32 to vector<16x128xf32>
    %131 = arith.cmpf ogt, %129, %130 : vector<16x128xf32>
    %cst_42 = arith.constant 0.00999999977 : f32
    %132 = vector.broadcast %cst_42 : f32 to vector<16x128xf32>
    %133 = arith.mulf %132, %129 : vector<16x128xf32>
    %134 = arith.select %131, %129, %133 : vector<16x128xi1>, vector<16x128xf32>
    %135 = arith.truncf %134 : vector<16x128xf32> to vector<16x128xbf16>
    %c0_43 = arith.constant 0 : index
    %c768 = arith.constant 768 : index
    %136 = vector.load %arg3[%c0_43, %c768] : memref<128x896xbf16, #tpu.memory_space<vmem>>, vector<128x128xbf16>
    %cst_44 = arith.constant dense<0.000000e+00> : vector<16x128xf32>
    %137 = tpu.matmul %135, %136, %cst_44 {dimension_numbers = #tpu.dot_dimension_numbers<[1], [0], [0], [1], [0, 0, 1, 1], [], []>} : vector<16x128xbf16>, vector<128x128xbf16>, vector<16x128xf32> -> vector<16x128xf32>
    %c0_45 = arith.constant 0 : index
    %c768_46 = arith.constant 768 : index
    %138 = vector.load %arg4[%c0_45, %c768_46] : memref<1x896xf32, #tpu.memory_space<vmem>>, vector<1x128xf32>
    %139 = vector.broadcast %138 : vector<1x128xf32> to vector<16x128xf32>
    %140 = arith.addf %137, %139 : vector<16x128xf32>
    %141 = vector.shape_cast %140 : vector<16x128xf32> to vector<2x8x128xf32>
    %c0_47 = arith.constant 0 : index
    %c0_48 = arith.constant 0 : index
    %c0_49 = arith.constant 0 : index
    %142 = vector.load %arg7[%c0_47, %c0_48, %c0_49] : memref<2x8x128xf32, #tpu.memory_space<vmem>>, vector<2x8x128xf32>
    tpu.vector_store %arg7[%c0_47, %c0_48, %c0_49], %141 {strides = array<i32>} : memref<2x8x128xf32, #tpu.memory_space<vmem>>, vector<2x8x128xf32>,
    return
  }
  func.func @transform_0(%arg0: i32) -> (i32, i32, i32) {
    %c0_i32 = arith.constant 0 : i32
    %c0_i32_0 = arith.constant 0 : i32
    %c0_i32_1 = arith.constant 0 : i32
    return %arg0, %c0_i32, %c0_i32_0 : i32, i32, i32
  }
  func.func @transform_1(%arg0: i32) -> (i32, i32) {
    %c0_i32 = arith.constant 0 : i32
    %c0_i32_0 = arith.constant 0 : i32
    %c0_i32_1 = arith.constant 0 : i32
    return %c0_i32, %c0_i32_0 : i32, i32
  }
  func.func @transform_2(%arg0: i32) -> (i32, i32) {
    %c0_i32 = arith.constant 0 : i32
    %c0_i32_0 = arith.constant 0 : i32
    %c0_i32_1 = arith.constant 0 : i32
    return %c0_i32, %c0_i32_0 : i32, i32
  }
  func.func @transform_3(%arg0: i32) -> (i32, i32) {
    %c0_i32 = arith.constant 0 : i32
    %c0_i32_0 = arith.constant 0 : i32
    %c0_i32_1 = arith.constant 0 : i32
    return %c0_i32, %c0_i32_0 : i32, i32
  }
  func.func @transform_4(%arg0: i32) -> (i32, i32) {
    %c0_i32 = arith.constant 0 : i32
    %c0_i32_0 = arith.constant 0 : i32
    %c0_i32_1 = arith.constant 0 : i32
    return %c0_i32, %c0_i32_0 : i32, i32
  }
  func.func @transform_5(%arg0: i32) -> (i32, i32) {
    %c0_i32 = arith.constant 0 : i32
    %c0_i32_0 = arith.constant 0 : i32
    %c0_i32_1 = arith.constant 0 : i32
    return %c0_i32, %c0_i32_0 : i32, i32
  }
  func.func @transform_6(%arg0: i32) -> (i32, i32, i32) {
    %c0_i32 = arith.constant 0 : i32
    %c0_i32_0 = arith.constant 0 : i32
    %c0_i32_1 = arith.constant 0 : i32
    return %arg0, %c0_i32, %c0_i32_0 : i32, i32, i32
  }
}

</mosaic_0001>

<bundles_post_ra>
// kernel: tpu_custom_call.1
= control target key start
LH: loop header
LB: loop body
LE: loop exit
PB: predicated region body
PF: predicated region fallthrough
CT: control target
= control target key end

     0   :  { %11 = vsyncpa [#allocation3], 0  ;;  %s1945_s0 = inlined_call_operand.hbm [shape: f32[2,8,128], index: 0, kind: input, shape index: {}]   ;;  %s1946_s1 = inlined_call_operand.hbm [shape: f32[8,128], index: 1, kind: input, shape index: {}]   ;;  %s1947_s2 = inlined_call_operand.hbm [shape: bf16[128,896], index: 2, kind: input, shape index: {}]   ;;  %s1948_s3 = inlined_call_operand.vmem [shape: f32[1,896], index: 3, kind: input, shape index: {}]   ;;  %s1949_s4 = inlined_call_operand.hbm [shape: bf16[256,128], index: 4, kind: input, shape index: {}]   ;;  %s1950_s5 = inlined_call_operand.vmem [shape: f32[8,128], index: 5, kind: input, shape index: {}]   ;;  %s1951_s6 = inlined_call_operand.hbm [shape: f32[2,8,128], index: 6, kind: output, shape index: {}]  }
   0x1   :  { %12 = vsyncpa [#allocation6], 0 }
   0x2   :  { %13 = vsyncpa [#allocation9], 0 }
   0x3   :  { %14 = vsyncpa [#allocation4], 0  ;;  %s1698_s21 = smov [#allocation5]   ;;  %s1699_s23 = smov [#allocation2]  }
   0x4   :  { %s33_s22 = sshll.u32 %s1698_s21, 4  ;;  %s20_s24 = sshll.u32 %s1699_s23, 4  ;;  %s34_s22 = int_to_ptr.vmem [resolvable:$true] %s33_s22  ;;  %s1747_s24 = int_to_ptr.vmem [resolvable:$true] %s20_s24 }
   0x5   :  { %s1580_s27 = scalar_lea.hbm %s1946_s1, 128 }
   0x6   :  { %p1581_p0 = scmp.ne.s32.totalorder %s1946_s1, %s1580_s27  ;;  %p1584_p1 = scmp.lt.u32.totalorder %s1580_s27, %s1946_s1 }
   0x8   :  { %p1586_p2 = pnand %p1584_p1, %p1581_p0 }
   0xa   :  { %1589 = shalt.err (!%p1586_p2)
}
   0xb   :  { %s1590_s8 = scalar_lea.vmem %s34_s22, 128  ;;  %p1595_p4 = scmp.lt.s32.totalorder %s34_s22, %s34_s22 }
   0xc   :  { %p1591_p3 = scmp.ne.s32.totalorder %s34_s22, %s1590_s8  ;;  %p1596_p5 = scmp.lt.s32.totalorder %s1590_s8, %s1590_s8 }
   0xe   :  { %p1597_p6 = por %p1596_p5, %p1595_p4 }
  0x10   :  { %p1598_p7 = pnand %p1597_p6, %p1591_p3 }
  0x12   :  { %1601 = shalt.err (!%p1598_p7)
}
  0x13   :  { %36 = dma.hbm_to_vmem [thread:$0]  %s1946_s1, 128, %s34_s22, [#allocation6]  }
  0x14   :  { %s1602_s13 = scalar_lea.hbm %s1945_s0, 256 }
  0x15   :  { %p1603_p8 = scmp.ne.s32.totalorder %s1945_s0, %s1602_s13  ;;  %p1606_p9 = scmp.lt.u32.totalorder %s1602_s13, %s1945_s0 }
  0x17   :  { %p1608_p10 = pnand %p1606_p9, %p1603_p8 }
  0x19   :  { %1611 = shalt.err (!%p1608_p10)
}
  0x1a   :  { %s1612_s18 = scalar_lea.vmem %s1747_s24, 256  ;;  %p1617_p12 = scmp.lt.s32.totalorder %s1747_s24, %s1747_s24 }
  0x1b   :  { %p1613_p11 = scmp.ne.s32.totalorder %s1747_s24, %s1612_s18  ;;  %p1618_p13 = scmp.lt.s32.totalorder %s1612_s18, %s1612_s18 }
  0x1d   :  { %p1619_p0 = por %p1618_p13, %p1617_p12 }
  0x1f   :  { %p1620_p1 = pnand %p1619_p0, %p1613_p11 }
  0x21   :  { %1623 = shalt.err (!%p1620_p1)
}
  0x22   :  { %s1700_s1 = smov 128   ;;  %s1701_s19 = smov 8  }
  0x23   :  { %26 = dma.hbm_to_vmem [thread:$0]  %s1945_s0, 256, %s1747_s24, [#allocation3], %s1700_s1, %s1700_s1, %s1701_s19  }
  0x24   :  { %s1702_s22 = smov [#allocation7]   ;;  %s1624_s27 = scalar_lea.hbm %s1947_s2, 7168 }
  0x25   :  { %s42_s23 = sshll.u32 %s1702_s22, 4  ;;  %p1625_p2 = scmp.ne.s32.totalorder %s1947_s2, %s1624_s27  ;;  %s43_s23 = int_to_ptr.vmem [resolvable:$true] %s42_s23 }
  0x26   :  { %p1628_p3 = scmp.lt.u32.totalorder %s1624_s27, %s1947_s2 }
  0x28   :  { %p1630_p4 = pnand %p1628_p3, %p1625_p2 }
  0x2a   :  { %1633 = shalt.err (!%p1630_p4)
}
  0x2b   :  { %s1634_s8 = scalar_lea.vmem %s43_s23, 7168  ;;  %p1639_p6 = scmp.lt.s32.totalorder %s43_s23, %s43_s23 }
  0x2c   :  { %p1635_p5 = scmp.ne.s32.totalorder %s43_s23, %s1634_s8  ;;  %p1640_p7 = scmp.lt.s32.totalorder %s1634_s8, %s1634_s8 }
  0x2e   :  { %p1641_p8 = por %p1640_p7, %p1639_p6 }
  0x30   :  { %p1642_p9 = pnand %p1641_p8, %p1635_p5 }
  0x32   :  { %1645 = shalt.err (!%p1642_p9)
}
  0x33   :  { %s1703_s0 = smov 448   ;;  %s1704_s24 = smov 28  }
  0x34   :  { %48 = dma.hbm_to_vmem [thread:$0]  %s1947_s2, 7168, %s43_s23, [#allocation6], %s1703_s0, %s1703_s0, %s1704_s24  }
  0x35   :  { %s1705_s11 = smov [#allocation8]   ;;  %s1646_s15 = scalar_lea.hbm %s1949_s4, 2048 }
  0x36   :  { %s56_s12 = sshll.u32 %s1705_s11, 4  ;;  %p1647_p10 = scmp.ne.s32.totalorder %s1949_s4, %s1646_s15  ;;  %s57_s12 = int_to_ptr.vmem [resolvable:$true] %s56_s12 }
  0x37   :  { %p1650_p11 = scmp.lt.u32.totalorder %s1646_s15, %s1949_s4 }
  0x39   :  { %p1652_p12 = pnand %p1650_p11, %p1647_p10 }
  0x3b   :  { %1655 = shalt.err (!%p1652_p12)
}
  0x3c   :  { %s1656_s21 = scalar_lea.vmem %s57_s12, 2048  ;;  %p1661_p0 = scmp.lt.s32.totalorder %s57_s12, %s57_s12 }
  0x3d   :  { %p1657_p13 = scmp.ne.s32.totalorder %s57_s12, %s1656_s21  ;;  %p1662_p1 = scmp.lt.s32.totalorder %s1656_s21, %s1656_s21 }
  0x3f   :  { %p1663_p2 = por %p1662_p1, %p1661_p0 }
  0x41   :  { %p1664_p3 = pnand %p1663_p2, %p1657_p13 }
  0x43   :  { %1667 = shalt.err (!%p1664_p3)
}
  0x44   :  { %s1706_s2 = smov 64   ;;  %s1707_s22 = smov 4  }
  0x45   :  { %62 = dma.hbm_to_vmem [thread:$0]  %s1949_s4, 2048, %s57_s12, [#allocation9], %s1706_s2, %s1706_s2, %s1707_s22  }
  0x46   :  { %1690 = dma.done.wait [#allocation3], 256  }
  0x47   :  { %1691 = vsyncadd [#allocation3], 4294967040 }
  0x48   :  { %1692 = dma.done.wait [#allocation6], 7296  }
  0x49   :  { %1693 = vsyncadd [#allocation6], 4294960000 }
  0x4a   :  { %1694 = dma.done.wait [#allocation9], 2048  }
  0x4b   :  { %1695 = vsyncadd [#allocation9], 4294965248  ;;  %v78_v0 = vld [vmem:[#allocation2] sm:$0xff]  ;;  %v80_v1 = vld [vmem:[#allocation5] sm:$0xff]  ;;  %v1708_v7 = vmov 0.0   ;;  %v1709_v33 = vmov 0   ;;  %v107_v43 = vlaneseq }
  0x4c   :  { %v79_v2 = vld [vmem:[#allocation2 + $0x8] sm:$0xff]  ;;  %v81_v3 = vadd.f32 %v80_v1, %v78_v0  ;;  %v1472_v5 = vld [vmem:[#allocation7 + $0x4] ss:$28 sps:$4 sm:$0xff]   ;;  %1374 = vmatprep.subr.bf16.mxu1 %v1708_v7  ;;  %v1476_v9 = vld [vmem:[#allocation7 + $0x3c] ss:$28 sps:$4 sm:$0xff]   ;;  %329 = vmatprep.mubr.bf16.mxu0 %v1709_v33  ;;  %vm1710_vm0 = vmmov 0  }
  0x4d   :  { %v82_v4 = vadd.f32 %v80_v1, %v79_v2  ;;  %v1474_v6 = vld [vmem:[#allocation7] ss:$28 sps:$4 sm:$0xff]   ;;  %v1475_v8 = vld [vmem:[#allocation7 + $0x8] ss:$28 sps:$4 sm:$0xff]   ;;  %297 = vmatprep.subr.bf16.mxu0 %v1472_v5  ;;  %v1478_v18 = vld [vmem:[#allocation7 + $0x38] ss:$28 sps:$4 sm:$0xff]   ;;  %1390 = vmatprep.mubr.msk.bf16.mxu1 %vm1710_vm0, %v1708_v7 }
  0x4e   :  { %84 = vadd.xlane.f32.xlu0 %v81_v3  ;;  %298 = vmatpush1.bf16.msra.mxu0 %v1474_v6  ;;  %v1479_v19 = vld [vmem:[#allocation7 + $0x40] ss:$28 sps:$4 sm:$0xff]   ;;  %v1480_v20 = vld [vmem:[#allocation7 + $0x74] ss:$28 sps:$4 sm:$0xff]   ;;  %v1484_v23 = vld [vmem:[#allocation7 + $0xac] ss:$28 sps:$4 sm:$0xff]  }
  0x4f   :  { %1375 = vmatpush3.bf16.msra.mxu1 %v1475_v8  ;;  %299 = vmatprep.subr.bf16.mxu0 %v1476_v9  ;;  %v1482_v21 = vld [vmem:[#allocation7 + $0x70] ss:$28 sps:$4 sm:$0xff]   ;;  %v1483_v22 = vld [vmem:[#allocation7 + $0x78] ss:$28 sps:$4 sm:$0xff]   ;;  %v1486_v24 = vld [vmem:[#allocation7 + $0xa8] ss:$28 sps:$4 sm:$0xff]  }
  0x50   :  { %1376 = vmatprep.subr.bf16.mxu1 %v1708_v7  ;;  %v1487_v25 = vld [vmem:[#allocation7 + $0xb0] ss:$28 sps:$4 sm:$0xff]   ;;  %v1488_v26 = vld [vmem:[#allocation7 + $0xe4] ss:$28 sps:$4 sm:$0xff]   ;;  %v1492_v29 = vld [vmem:[#allocation7 + $0x11c] ss:$28 sps:$4 sm:$0xff]  }
  0x51   :  { %v1490_v27 = vld [vmem:[#allocation7 + $0xe0] ss:$28 sps:$4 sm:$0xff]   ;;  %v1491_v28 = vld [vmem:[#allocation7 + $0xe8] ss:$28 sps:$4 sm:$0xff]   ;;  %v1494_v30 = vld [vmem:[#allocation7 + $0x118] ss:$28 sps:$4 sm:$0xff]  }
  0x52   :  { %86 = vadd.xlane.f32.xlu0 %v82_v4  ;;  %300 = vmatpush1.bf16.msra.mxu0 %v1478_v18  ;;  %v1495_v31 = vld [vmem:[#allocation7 + $0x120] ss:$28 sps:$4 sm:$0xff]   ;;  %v1496_v32 = vld [vmem:[#allocation7 + $0x154] ss:$28 sps:$4 sm:$0xff]   ;;  %v1500_v36 = vld [vmem:[#allocation7 + $0x18c] ss:$28 sps:$4 sm:$0xff]  }
  0x53   :  { %1377 = vmatpush3.bf16.msra.mxu1 %v1479_v19  ;;  %301 = vmatprep.subr.bf16.mxu0 %v1480_v20  ;;  %v1498_v34 = vld [vmem:[#allocation7 + $0x150] ss:$28 sps:$4 sm:$0xff]   ;;  %v1499_v35 = vld [vmem:[#allocation7 + $0x158] ss:$28 sps:$4 sm:$0xff]   ;;  %v1502_v37 = vld [vmem:[#allocation7 + $0x188] ss:$28 sps:$4 sm:$0xff]  }
  0x54   :  { %1378 = vmatprep.subr.bf16.mxu1 %v1708_v7  ;;  %v1503_v38 = vld [vmem:[#allocation7 + $0x190] ss:$28 sps:$4 sm:$0xff]   ;;  %v1826_v46 = vshrl.u32 %v107_v43, 7  ;;  %v152_v61 = vld [vmem:[%s1948_s3] sm:$0x7]  ;;  %vm495_vm1 = vcmask 1043456  }
  0x55   :  { %v1834_v48 = vld [vmem:[%s1950_s5] sm:$0xff]  ;;  %vm465_vm2 = vcmask 64512   ;;  %s1711_s24 = smov [#allocation10]  }
  0x56   :  { %302 = vmatpush1.bf16.msra.mxu0 %v1482_v21  ;;  %v1829_v47 = vsub.s32 0, %v1826_v46  ;;  %v1840_v52 = vsub.s32 1, %v1826_v46  ;;  %v164_v62 = vsub.s32 2, %v1826_v46  ;;  %s1227_s9 = sshll.u32 %s1711_s24, 4  ;;  %s1228_s9 = int_to_ptr.vmem [resolvable:$true] %s1227_s9 }
  0x57   :  { %1379 = vmatpush3.bf16.msra.mxu1 %v1483_v22  ;;  %303 = vmatprep.subr.bf16.mxu0 %v1484_v23  ;;  %s1668_s10 = scalar_lea.vmem %s1228_s9, 256  ;;  %p1673_p5 = scmp.lt.s32.totalorder %s1228_s9, %s1228_s9 }
  0x58   :  { %1380 = vmatprep.subr.bf16.mxu1 %v1708_v7  ;;  %v110_v51 = vrot.slane %v1834_v48, %v1829_v47  ;;  %v116_v56 = vrot.slane %v1834_v48, %v1840_v52  ;;  %v161_v63 = vrot.slane %v152_v61, %v1840_v52  ;;  %v165_v2 = vrot.slane %v152_v61, %v164_v62  ;;  %p1669_p4 = scmp.ne.s32.totalorder %s1228_s9, %s1668_s10  ;;  %p1674_p6 = scmp.lt.s32.totalorder %s1668_s10, %s1668_s10 }
  0x59   :  { %v157_v9 = vrot.slane %v152_v61, %v1829_v47  ;;  %v1505_v61 = vld [vmem:[#allocation7 + $0x44] ss:$28 sps:$4 sm:$0xff]  }
  0x5a   :  { %304 = vmatpush1.bf16.msra.mxu0 %v1486_v24  ;;  %p1675_p7 = por %p1674_p6, %p1673_p5 }
  0x5b   :  { %1381 = vmatpush3.bf16.msra.mxu1 %v1487_v25  ;;  %305 = vmatprep.subr.bf16.mxu0 %v1488_v26 }
  0x5c   :  { %1382 = vmatprep.subr.bf16.mxu1 %v1708_v7  ;;  %p1676_p8 = pnand %p1675_p7, %p1669_p4 }
  0x5e   :  { %306 = vmatpush1.bf16.msra.mxu0 %v1490_v27 }
  0x5f   :  { %1383 = vmatpush3.bf16.msra.mxu1 %v1491_v28  ;;  %307 = vmatprep.subr.bf16.mxu0 %v1492_v29 }
  0x60   :  { %1384 = vmatprep.subr.bf16.mxu1 %v1708_v7 }
  0x62   :  { %308 = vmatpush1.bf16.msra.mxu0 %v1494_v30 }
  0x63   :  { %1385 = vmatpush3.bf16.msra.mxu1 %v1495_v31  ;;  %309 = vmatprep.subr.bf16.mxu0 %v1496_v32 }
  0x64   :  { %1386 = vmatprep.subr.bf16.mxu1 %v1708_v7 }
  0x66   :  { %310 = vmatpush1.bf16.msra.mxu0 %v1498_v34 }
  0x67   :  { %1387 = vmatpush3.bf16.msra.mxu1 %v1499_v35  ;;  %311 = vmatprep.subr.bf16.mxu0 %v1500_v36 }
  0x68   :  { %1388 = vmatprep.subr.bf16.mxu1 %v1708_v7 }
  0x6a   :  { %312 = vmatpush1.bf16.msra.mxu0 %v1502_v37 }
  0x6b   :  { %1389 = vmatpush3.bf16.msra.mxu1 %v1503_v38  ;;  %1394 = vmatprep.subr.bf16.mxu0 %v1708_v7 }
  0x6c   :  { %1400 = vmatprep.subr.bf16.mxu1 %v1708_v7 }
  0xdb   :  { %v85_v10 = vpop.xlane.xlu0 %84 }
  0xdc   :  { %v89_v11 = vmul.f32 0.0078125, %v85_v10 }
  0xde   :  { %v1807_v12 = vsub.f32 %v81_v3, %v89_v11 }
  0xdf   :  { %v87_v13 = vpop.xlane.xlu0 %86 }
  0xe0   :  { %v90_v14 = vmul.f32 0.0078125, %v87_v13  ;;  %v93_v15 = vmul.f32 %v1807_v12, %v1807_v12 }
  0xe2   :  { %v1811_v16 = vsub.f32 %v82_v4, %v90_v14  ;;  %95 = vadd.xlane.f32.xlu1 %v93_v15 }
  0xe4   :  { %v94_v17 = vmul.f32 %v1811_v16, %v1811_v16 }
  0xe6   :  { %97 = vadd.xlane.f32.xlu1 %v94_v17 }
 0x16f   :  { %v96_v39 = vpop.xlane.xlu1 %95 }
 0x170   :  { %v99_v40 = vmul.f32 0.0078125, %v96_v39 }
 0x172   :  { %v101_v41 = vadd.f32 1e-05, %v99_v40 }
 0x173   :  { %v98_v42 = vpop.xlane.xlu1 %97 }
 0x174   :  { %1560 = vrsqrt.f32 %v101_v41  ;;  %v100_v44 = vmul.f32 0.0078125, %v98_v42 }
 0x176   :  { %v102_v45 = vadd.f32 1e-05, %v100_v44 }
 0x178   :  { %1562 = vrsqrt.f32 %v102_v45 }
 0x17e   :  { %v1561_v49 = vpop.eup %1560 }
 0x17f   :  { %v105_v50 = vmul.f32 %v1561_v49, %v1807_v12 }
 0x181   :  { %v111_v55 = vmul.f32 %v110_v51, %v105_v50 }
 0x182   :  { %v1563_v53 = vpop.eup %1562 }
 0x183   :  { %v106_v54 = vmul.f32 %v1563_v53, %v1811_v16  ;;  %v1845_v58 = vadd.f32 %v116_v56, %v111_v55  ;;  %v1504_v55 = vld [vmem:[#allocation7 + $0xc] ss:$28 sps:$4 sm:$0xff]  }
 0x185   :  { %v112_v57 = vmul.f32 %v110_v51, %v106_v54 }
 0x187   :  { %v1847_v59 = vadd.f32 %v116_v56, %v112_v57 }
 0x189   :  { %v119_v60 = vpack.c.bf16 %v1847_v59, %v1845_v58 }
 0x18b   :  { %330 = vmatmul.mubr.bf16.vlgmr.msra.gmra.mrb[0].mxu0 %v119_v60  ;;  %1391 = vmatmul.mubr.bf16.vlgmr.msra.gmra.mrb[0].mxu1 %v119_v60 }
 0x18c   :  { %1396 = vmatprep.mubr.msk.bf16.mxu0 %vm1710_vm0, %v1708_v7  ;;  %1402 = vmatprep.mubr.msk.bf16.mxu1 %vm1710_vm0, %v1708_v7 }
 0x25e   :  { %v331_v0 = vpop.f32.mrb[0].mxu0  ;;  %v374_v1 = vpop.f32.mrb[0].mxu1 }
 0x25f   :  { %v333_v3 = vpop.f32.mrb[1].mxu0  ;;  %v1392_v4 = vpop.f32.mrb[1].mxu1  ;;  %v375_v14 = vadd.f32 %v374_v1, %v165_v2  ;;  %v332_v16 = vadd.f32 %v331_v0, %v157_v9  ;;  %v1507_v0 = vld [vmem:[#allocation7 + $0xb4] ss:$28 sps:$4 sm:$0xff]   ;;  %v1508_v1 = vld [vmem:[#allocation7 + $0xec] ss:$28 sps:$4 sm:$0xff]  }
 0x260   :  { %v334_v5 = vadd.f32 %v333_v3, %v161_v63  ;;  %v335_v6 = vpop.f32.mrb[2].mxu0  ;;  %v377_v8 = vpop.f32.mrb[2].mxu1  ;;  %v1510_v3 = vld [vmem:[#allocation7 + $0x15c] ss:$28 sps:$4 sm:$0xff]  }
 0x261   :  { %v337_v10 = vpop.f32.mrb[3].mxu0  ;;  %v1393_v11 = vpop.f32.mrb[3].mxu1  ;;  %v378_v17 = vadd.f32 %v377_v8, %v165_v2  ;;  %v490_v18 = vpack.c.bf16 %v375_v14, %v375_v14  ;;  %v336_v19 = vadd.f32 %v335_v6, %v157_v9  ;;  %v381_v20 = vpack.c.bf16 %v332_v16, %v332_v16  ;;  %v1509_v2 = vld [vmem:[#allocation7 + $0x124] ss:$28 sps:$4 sm:$0xff]   ;;  %v1267_v14 = vld [vmem:[%s1948_s3 + $0x3] ss:$0 sm:$0xff] }
 0x262   :  { %v383_v12 = vpack.c.bf16 %v334_v5, %v334_v5  ;;  %v338_v13 = vadd.f32 %v337_v10, %v161_v63  ;;  %v1506_v63 = vld [vmem:[#allocation7 + $0x7c] ss:$28 sps:$4 sm:$0xff]  }
 0x263   :  { %v491_v21 = vpack.c.bf16 %v378_v17, %v378_v17  ;;  %v497_v22 = vsel %vm495_vm1, %v490_v18, 0  ;;  %v382_v23 = vpack.c.bf16 %v336_v19, %v336_v19 }
 0x264   :  { %v384_v15 = vpack.c.bf16 %v338_v13, %v338_v13  ;;  %1395 = vmatpush3.bf16.xpose.msra.mxu0 %v383_v12 }
 0x265   :  { %1406 = vmatprep.subr.bf16.mxu0 %v1708_v7  ;;  %v543_v24 = vsel %vm495_vm1, %v491_v21, 0 }
 0x266   :  { %1401 = vmatpush3.bf16.xpose.msra.mxu1 %v384_v15 }
 0x267   :  { %1412 = vmatprep.subr.bf16.mxu1 %v1708_v7 }
 0x26b   :  { %1397 = vmatmul.mubr.bf16.vlgmr.msra.gmra.mrb[4].mxu0 %v381_v20 }
 0x26c   :  { %1407 = vmatpush3.bf16.msra.mxu0 %v497_v22  ;;  %1408 = vmatprep.mubr.msk.bf16.mxu0 %vm1710_vm0, %v1708_v7 }
 0x26d   :  { %1403 = vmatmul.mubr.bf16.vlgmr.msra.gmra.mrb[4].mxu1 %v382_v23  ;;  %1418 = vmatprep.subr.bf16.mxu0 %v1708_v7  ;;  %v1512_v23 = vld [vmem:[#allocation7 + $0x10] ss:$28 sps:$4 sm:$0xff]  }
 0x26e   :  { %1413 = vmatpush3.bf16.msra.mxu1 %v543_v24  ;;  %1414 = vmatprep.mubr.msk.bf16.mxu1 %vm1710_vm0, %v1708_v7  ;;  %v1514_v24 = vld [vmem:[#allocation7 + $0x14] ss:$28 sps:$4 sm:$0xff]  }
 0x26f   :  { %843 = vmatprep.subr.bf16.mxu1 %v1514_v24 }
 0x33e   :  { %v419_v25 = vpop.f32.mrb[4].mxu0 }
 0x33f   :  { %v1398_v26 = vpop.f32.mrb[5].mxu0  ;;  %v466_v27 = vsel %vm465_vm2, %v419_v25, -inf }
 0x340   :  { %v459_v28 = vpop.f32.mrb[4].mxu1  ;;  %467 = vmax.xlane.f32.xlu0 %v466_v27  ;;  %v422_v29 = vpop.f32.mrb[6].mxu0  ;;  %v1515_v26 = vld [vmem:[#allocation7 + $0x48] ss:$28 sps:$4 sm:$0xff]  }
 0x341   :  { %v1399_v30 = vpop.f32.mrb[7].mxu0  ;;  %v1404_v31 = vpop.f32.mrb[5].mxu1  ;;  %v469_v32 = vsel %vm465_vm2, %v459_v28, -inf }
 0x342   :  { %470 = vmax.xlane.f32.xlu1 %v469_v32  ;;  %v462_v34 = vpop.f32.mrb[6].mxu1 }
 0x343   :  { %v1405_v35 = vpop.f32.mrb[7].mxu1  ;;  %v1520_v34 = vld [vmem:[#allocation7 + $0x84] ss:$28 sps:$4 sm:$0xff]  }
 0x344   :  { %v1518_v35 = vld [vmem:[#allocation7 + $0x80] ss:$28 sps:$4 sm:$0xff]  }
 0x3cd   :  { %v468_v36 = vpop.xlane.xlu0 %467 }
 0x3ce   :  { %v472_v37 = vsub.f32 %v419_v25, %v468_v36  ;;  %v1517_v25 = vld [vmem:[#allocation7 + $0x4c] ss:$28 sps:$4 sm:$0xff]   ;;  %v1523_v36 = vld [vmem:[#allocation7 + $0xbc] ss:$28 sps:$4 sm:$0xff]  }
 0x3cf   :  { %v471_v38 = vpop.xlane.xlu1 %470 }
 0x3d0   :  { %v474_v39 = vmul.f32 1.442695, %v472_v37  ;;  %v473_v40 = vsub.f32 %v459_v28, %v471_v38  ;;  %v1521_v37 = vld [vmem:[#allocation7 + $0xb8] ss:$28 sps:$4 sm:$0xff]  }
 0x3d1   :  { %v1526_v38 = vld [vmem:[#allocation7 + $0xf4] ss:$28 sps:$4 sm:$0xff]  }
 0x3d2   :  { %1564 = vpow2.f32 %v474_v39  ;;  %v476_v41 = vmul.f32 1.442695, %v473_v40  ;;  %v1524_v39 = vld [vmem:[#allocation7 + $0xf0] ss:$28 sps:$4 sm:$0xff]  }
 0x3d3   :  { %v1529_v40 = vld [vmem:[#allocation7 + $0x12c] ss:$28 sps:$4 sm:$0xff]  }
 0x3d4   :  { %1566 = vpow2.f32 %v476_v41  ;;  %v1527_v41 = vld [vmem:[#allocation7 + $0x128] ss:$28 sps:$4 sm:$0xff]  }
 0x3dc   :  { %v1565_v42 = vpop.eup %1564 }
 0x3dd   :  { %v478_v43 = vsel %vm465_vm2, %v1565_v42, 0.0 }
 0x3de   :  { %v1567_v44 = vpop.eup %1566  ;;  %479 = vadd.xlane.f32.xlu0 %v478_v43  ;;  %v1530_v43 = vld [vmem:[#allocation7 + $0x160] ss:$28 sps:$4 sm:$0xff]  }
 0x3df   :  { %v481_v45 = vsel %vm465_vm2, %v1567_v44, 0.0 }
 0x3e0   :  { %482 = vadd.xlane.f32.xlu1 %v481_v45  ;;  %v1533_v45 = vld [vmem:[#allocation7 + $0x198] ss:$28 sps:$4 sm:$0xff]  }
 0x46b   :  { %v480_v49 = vpop.xlane.xlu0 %479 }
 0x46c   :  { %1568 = vrcp.f32 %v480_v49  ;;  %v1536_v49 = vld [vmem:[#allocation8 + $0x40] sm:$0xff]  }
 0x46d   :  { %v483_v50 = vpop.xlane.xlu1 %482 }
 0x46e   :  { %1570 = vrcp.f32 %v483_v50  ;;  %v1537_v50 = vld [vmem:[#allocation8] sm:$0xff]  }
 0x476   :  { %v1569_v51 = vpop.eup %1568 }
 0x477   :  { %v486_v53 = vmul.f32 %v1569_v51, %v1565_v42  ;;  %v1532_v42 = vld [vmem:[#allocation7 + $0x164] ss:$28 sps:$4 sm:$0xff]   ;;  %v1538_v51 = vld [vmem:[#allocation8 + $0x48] sm:$0xff]  }
 0x478   :  { %v1571_v54 = vpop.eup %1570 }
 0x479   :  { %v487_v56 = vmul.f32 %v1571_v54, %v1567_v44  ;;  %v488_v57 = vpack.c.bf16 %v486_v53, %v486_v53  ;;  %v1535_v44 = vld [vmem:[#allocation7 + $0x19c] ss:$28 sps:$4 sm:$0xff]   ;;  %v1539_v53 = vld [vmem:[#allocation8 + $0x8] sm:$0xff]   ;;  %v1540_v54 = vld [vmem:[#allocation8 + $0x50] sm:$0xff]  }
 0x47b   :  { %1409 = vmatmul.mubr.msk.bf16.vlgmr.msra.gmra.mrb[8].mxu0 %vm465_vm2, %v488_v57  ;;  %v489_v60 = vpack.c.bf16 %v487_v56, %v487_v56  ;;  %v1542_v56 = vld [vmem:[#allocation8 + $0x58] sm:$0xff]  }
 0x47c   :  { %1419 = vmatpush3.bf16.msra.mxu0 %v1504_v55  ;;  %1434 = vmatprep.mubr.msk.bf16.mxu0 %vm1710_vm0, %v1708_v7  ;;  %v1541_v55 = vld [vmem:[#allocation8 + $0x10] sm:$0xff]   ;;  %v1543_v57 = vld [vmem:[#allocation8 + $0x18] sm:$0xff]  }
 0x47d   :  { %1415 = vmatmul.mubr.msk.bf16.vlgmr.msra.gmra.mrb[8].mxu1 %vm465_vm2, %v489_v60  ;;  %1420 = vmatprep.subr.bf16.mxu0 %v1708_v7  ;;  %v1544_v60 = vld [vmem:[#allocation8 + $0x60] sm:$0xff]  }
 0x47e   :  { %875 = vmatprep.mubr.bf16.mxu1 %v1709_v33  ;;  %v1511_v33 = vld [vmem:[#allocation7 + $0x194] ss:$28 sps:$4 sm:$0xff]   ;;  %844 = vmatpush1.bf16.msra.mxu1 %v1512_v23 }
 0x47f   :  { %845 = vmatprep.subr.bf16.mxu1 %v1517_v25 }
 0x480   :  { %1421 = vmatpush3.bf16.msra.mxu0 %v1505_v61  ;;  %v1545_v61 = vld [vmem:[#allocation8 + $0x20] sm:$0xff]  }
 0x481   :  { %1422 = vmatprep.subr.bf16.mxu0 %v1708_v7 }
 0x482   :  { %846 = vmatpush1.bf16.msra.mxu1 %v1515_v26 }
 0x483   :  { %847 = vmatprep.subr.bf16.mxu1 %v1520_v34 }
 0x484   :  { %1423 = vmatpush3.bf16.msra.mxu0 %v1506_v63  ;;  %v1546_v63 = vld [vmem:[#allocation8 + $0x68] sm:$0xff]  }
 0x485   :  { %1424 = vmatprep.subr.bf16.mxu0 %v1708_v7 }
 0x486   :  { %848 = vmatpush1.bf16.msra.mxu1 %v1518_v35 }
 0x487   :  { %849 = vmatprep.subr.bf16.mxu1 %v1523_v36 }
 0x488   :  { %1425 = vmatpush3.bf16.msra.mxu0 %v1507_v0 }
 0x489   :  { %1426 = vmatprep.subr.bf16.mxu0 %v1708_v7 }
 0x48a   :  { %850 = vmatpush1.bf16.msra.mxu1 %v1521_v37 }
 0x48b   :  { %851 = vmatprep.subr.bf16.mxu1 %v1526_v38 }
 0x48c   :  { %1427 = vmatpush3.bf16.msra.mxu0 %v1508_v1 }
 0x48d   :  { %1428 = vmatprep.subr.bf16.mxu0 %v1708_v7 }
 0x48e   :  { %852 = vmatpush1.bf16.msra.mxu1 %v1524_v39 }
 0x48f   :  { %853 = vmatprep.subr.bf16.mxu1 %v1529_v40 }
 0x490   :  { %1429 = vmatpush3.bf16.msra.mxu0 %v1509_v2 }
 0x491   :  { %1430 = vmatprep.subr.bf16.mxu0 %v1708_v7 }
 0x492   :  { %854 = vmatpush1.bf16.msra.mxu1 %v1527_v41 }
 0x493   :  { %855 = vmatprep.subr.bf16.mxu1 %v1532_v42 }
 0x494   :  { %1431 = vmatpush3.bf16.msra.mxu0 %v1510_v3 }
 0x495   :  { %1432 = vmatprep.subr.bf16.mxu0 %v1708_v7 }
 0x496   :  { %856 = vmatpush1.bf16.msra.mxu1 %v1530_v43 }
 0x497   :  { %857 = vmatprep.subr.bf16.mxu1 %v1535_v44 }
 0x498   :  { %1433 = vmatpush3.bf16.msra.mxu0 %v1511_v33 }
 0x499   :  { %1343 = vmatprep.subr.bf16.mxu0 %v1536_v49 }
 0x49a   :  { %858 = vmatpush1.bf16.msra.mxu1 %v1533_v45 }
 0x49b   :  { %1438 = vmatprep.subr.bf16.mxu1 %v1708_v7 }
 0x54e   :  { %v533_v4 = vpop.f32.mrb[8].mxu0 }
 0x54f   :  { %v1410_v5 = vpop.f32.mrb[9].mxu0 }
 0x550   :  { %v536_v6 = vpop.f32.mrb[10].mxu0  ;;  %v579_v8 = vpop.f32.mrb[8].mxu1  ;;  %v725_v5 = vrot.slane %v1834_v48, %v164_v62  ;;  %v1547_v62 = vld [vmem:[#allocation8 + $0x28] sm:$0xff]  }
 0x551   :  { %v585_v9 = vpack.c.bf16 %v579_v8, %v533_v4  ;;  %v1411_v10 = vpop.f32.mrb[11].mxu0  ;;  %v1416_v11 = vpop.f32.mrb[9].mxu1  ;;  %v730_v6 = vsub.s32 3, %v1826_v46 }
 0x552   :  { %v582_v12 = vpop.f32.mrb[10].mxu1 }
 0x553   :  { %v1417_v13 = vpop.f32.mrb[11].mxu1  ;;  %1435 = vmatmul.mubr.bf16.vlgmr.msra.gmra.mrb[12].mxu0 %v585_v9 }
 0x554   :  { %1344 = vmatpush3.bf16.msra.mxu0 %v1537_v50  ;;  %v731_v13 = vrot.slane %v1834_v48, %v730_v6 }
 0x555   :  { %1345 = vmatprep.subr.bf16.mxu0 %v1538_v51  ;;  %v1552_v51 = vld [vmem:[#allocation7 + $0x18] ss:$28 sps:$4 sm:$0xff]  }
 0x558   :  { %1346 = vmatpush3.bf16.msra.mxu0 %v1539_v53 }
 0x559   :  { %1347 = vmatprep.subr.bf16.mxu0 %v1540_v54 }
 0x55c   :  { %1348 = vmatpush3.bf16.msra.mxu0 %v1541_v55 }
 0x55d   :  { %1349 = vmatprep.subr.bf16.mxu0 %v1542_v56 }
 0x560   :  { %1350 = vmatpush3.bf16.msra.mxu0 %v1543_v57 }
 0x561   :  { %1351 = vmatprep.subr.bf16.mxu0 %v1544_v60 }
 0x564   :  { %1352 = vmatpush3.bf16.msra.mxu0 %v1545_v61 }
 0x565   :  { %1353 = vmatprep.subr.bf16.mxu0 %v1546_v63 }
 0x568   :  { %1354 = vmatpush3.bf16.msra.mxu0 %v1547_v62 }
 0x626   :  { %v691_v15 = vpop.f32.mrb[12].mxu0 }
 0x627   :  { %v692_v16 = vadd.f32 %v1267_v14, %v691_v15  ;;  %v1436_v17 = vpop.f32.mrb[13].mxu0 }
 0x628   :  { %v694_v18 = vpop.f32.mrb[14].mxu0 }
 0x629   :  { %v695_v19 = vadd.f32 %v1267_v14, %v694_v18  ;;  %v1437_v20 = vpop.f32.mrb[15].mxu0  ;;  %v698_v21 = vadd.f32 %v692_v16, %v1845_v58  ;;  %v1548_v18 = vld [vmem:[#allocation8 + $0x70] sm:$0xff]  }
 0x62a   :  { %1355 = vmatprep.subr.bf16.mxu0 %v1548_v18  ;;  %v1550_v20 = vld [vmem:[#allocation8 + $0x78] sm:$0xff]  }
 0x62b   :  { %700 = vadd.xlane.f32.xlu0 %v698_v21  ;;  %v699_v22 = vadd.f32 %v695_v19, %v1847_v59  ;;  %v1549_v19 = vld [vmem:[#allocation8 + $0x30] sm:$0xff]  }
 0x62c   :  { %1356 = vmatpush3.bf16.msra.mxu0 %v1549_v19 }
 0x62d   :  { %702 = vadd.xlane.f32.xlu1 %v699_v22  ;;  %1357 = vmatprep.subr.bf16.mxu0 %v1550_v20 }
 0x6b8   :  { %v701_v27 = vpop.xlane.xlu0 %700 }
 0x6b9   :  { %v704_v28 = vmul.f32 0.0078125, %v701_v27 }
 0x6ba   :  { %v703_v29 = vpop.xlane.xlu1 %702 }
 0x6bb   :  { %v1891_v30 = vsub.f32 %v698_v21, %v704_v28  ;;  %v705_v31 = vmul.f32 0.0078125, %v703_v29  ;;  %v1551_v21 = vld [vmem:[#allocation8 + $0x38] sm:$0xff]  }
 0x6bc   :  { %1358 = vmatpush3.bf16.msra.mxu0 %v1551_v21 }
 0x6bd   :  { %v1893_v32 = vsub.f32 %v699_v22, %v705_v31  ;;  %v708_v58 = vmul.f32 %v1891_v30, %v1891_v30  ;;  %v751_v22 = vld [vmem:[%s1948_s3 + $0x4] sm:$0x3] }
 0x6be   :  { %v756_v23 = vrot.slane %v751_v22, %v1829_v47  ;;  %v760_v24 = vrot.slane %v751_v22, %v1840_v52  ;;  %v926_v47 = vsub.s32 6, %v1826_v46 }
 0x6bf   :  { %710 = vadd.xlane.f32.xlu0 %v708_v58  ;;  %v709_v59 = vmul.f32 %v1893_v32, %v1893_v32 }
 0x6c0   :  { %v927_v52 = vrot.slane %v1834_v48, %v926_v47 }
 0x6c1   :  { %712 = vadd.xlane.f32.xlu1 %v709_v59 }
 0x74c   :  { %v711_v0 = vpop.xlane.xlu0 %710 }
 0x74d   :  { %v714_v1 = vmul.f32 0.0078125, %v711_v0  ;;  %v1553_v0 = vld [vmem:[#allocation7 + $0x50] ss:$28 sps:$4 sm:$0xff]  }
 0x74e   :  { %v713_v2 = vpop.xlane.xlu1 %712 }
 0x74f   :  { %v716_v3 = vadd.f32 1e-05, %v714_v1  ;;  %v715_v33 = vmul.f32 0.0078125, %v713_v2  ;;  %v1554_v1 = vld [vmem:[#allocation7 + $0x88] ss:$28 sps:$4 sm:$0xff]  }
 0x750   :  { %v1555_v2 = vld [vmem:[#allocation7 + $0xc0] ss:$28 sps:$4 sm:$0xff]  }
 0x751   :  { %1572 = vrsqrt.f32 %v716_v3  ;;  %v717_v4 = vadd.f32 1e-05, %v715_v33  ;;  %v1556_v3 = vld [vmem:[#allocation7 + $0xf8] ss:$28 sps:$4 sm:$0xff]   ;;  %v1557_v33 = vld [vmem:[#allocation7 + $0x130] ss:$28 sps:$4 sm:$0xff]  }
 0x753   :  { %1574 = vrsqrt.f32 %v717_v4  ;;  %v1558_v4 = vld [vmem:[#allocation7 + $0x168] ss:$28 sps:$4 sm:$0xff]  }
 0x75b   :  { %v1573_v8 = vpop.eup %1572 }
 0x75c   :  { %v720_v9 = vmul.f32 %v1573_v8, %v1891_v30 }
 0x75d   :  { %v1575_v10 = vpop.eup %1574 }
 0x75e   :  { %v721_v11 = vmul.f32 %v1575_v10, %v1893_v32  ;;  %v726_v12 = vmul.f32 %v725_v5, %v720_v9 }
 0x760   :  { %v727_v14 = vmul.f32 %v725_v5, %v721_v11  ;;  %v732_v15 = vadd.f32 %v731_v13, %v726_v12  ;;  %v1559_v5 = vld [vmem:[#allocation7 + $0x1a0] ss:$28 sps:$4 sm:$0xff]  }
 0x762   :  { %v733_v16 = vadd.f32 %v731_v13, %v727_v14  ;;  %v1091_v13 = vsub.s32 4, %v1826_v46  ;;  %v1097_v14 = vsub.s32 5, %v1826_v46  ;;  %v1308_v46 = vld [vmem:[%s1948_s3 + $0x6] ss:$0 sm:$0xff] }
 0x764   :  { %v734_v17 = vpack.c.bf16 %v733_v16, %v732_v15  ;;  %v1098_v62 = vrot.slane %v1834_v48, %v1097_v14 }
 0x766   :  { %876 = vmatmul.mubr.bf16.vlgmr.msra.gmra.mrb[12].mxu1 %v734_v17 }
 0x767   :  { %1454 = vmatprep.mubr.msk.bf16.mxu1 %vm1710_vm0, %v1708_v7  ;;  %1439 = vmatpush3.bf16.msra.mxu1 %v1552_v51 }
 0x768   :  { %1440 = vmatprep.subr.bf16.mxu1 %v1708_v7 }
 0x76b   :  { %1441 = vmatpush3.bf16.msra.mxu1 %v1553_v0 }
 0x76c   :  { %1442 = vmatprep.subr.bf16.mxu1 %v1708_v7 }
 0x76f   :  { %1443 = vmatpush3.bf16.msra.mxu1 %v1554_v1 }
 0x770   :  { %1444 = vmatprep.subr.bf16.mxu1 %v1708_v7 }
 0x773   :  { %1445 = vmatpush3.bf16.msra.mxu1 %v1555_v2 }
 0x774   :  { %1446 = vmatprep.subr.bf16.mxu1 %v1708_v7 }
 0x777   :  { %1447 = vmatpush3.bf16.msra.mxu1 %v1556_v3 }
 0x778   :  { %1448 = vmatprep.subr.bf16.mxu1 %v1708_v7 }
 0x77b   :  { %1449 = vmatpush3.bf16.msra.mxu1 %v1557_v33 }
 0x77c   :  { %1450 = vmatprep.subr.bf16.mxu1 %v1708_v7 }
 0x77f   :  { %1451 = vmatpush3.bf16.msra.mxu1 %v1558_v4 }
 0x780   :  { %1452 = vmatprep.subr.bf16.mxu1 %v1708_v7 }
 0x783   :  { %1453 = vmatpush3.bf16.msra.mxu1 %v1559_v5 }
 0x839   :  { %v877_v25 = vpop.f32.mrb[12].mxu1 }
 0x83a   :  { %v878_v26 = vadd.f32 %v877_v25, %v756_v23  ;;  %v879_v27 = vpop.f32.mrb[13].mxu1 }
 0x83b   :  { %v880_v28 = vadd.f32 %v879_v27, %v760_v24  ;;  %v881_v29 = vpop.f32.mrb[14].mxu1 }
 0x83c   :  { %v882_v30 = vadd.f32 %v881_v29, %v756_v23  ;;  %v883_v31 = vpop.f32.mrb[15].mxu1  ;;  %v886_v58 = vmax.f32 %v878_v26, 0.0 }
 0x83d   :  { %v884_v32 = vadd.f32 %v883_v31, %v760_v24  ;;  %v887_v34 = vmax.f32 %v880_v28, 0.0 }
 0x83e   :  { %v888_v59 = vmax.f32 %v882_v30, 0.0 }
 0x83f   :  { %v889_v35 = vmax.f32 %v884_v32, 0.0 }
 0x840   :  { %v890_v36 = vpack.c.bf16 %v888_v59, %v886_v58 }
 0x841   :  { %v891_v37 = vpack.c.bf16 %v889_v35, %v887_v34 }
 0x843   :  { %1056 = vmatprep.mubr.bf16.mxu0 %v891_v37 }
 0x844   :  { %1057 = vmatmul.mubr.bf16.vlgmr.msra.gmra.mrb[16].mxu0 %v890_v36 }
 0x917   :  { %v1359_v38 = vpop.f32.mrb[16].mxu0 }
 0x918   :  { %v1360_v39 = vpop.f32.mrb[17].mxu0 }
 0x919   :  { %v1361_v40 = vadd.f32 %v1360_v39, %v1359_v38  ;;  %v1362_v41 = vpop.f32.mrb[18].mxu0 }
 0x91a   :  { %v1363_v42 = vpop.f32.mrb[19].mxu0 }
 0x91b   :  { %v1059_v43 = vadd.f32 %v1361_v40, %v927_v52  ;;  %v1364_v44 = vadd.f32 %v1363_v42, %v1362_v41 }
 0x91d   :  { %v1062_v45 = vadd.f32 %v1364_v44, %v927_v52  ;;  %v1065_v49 = vadd.f32 %v1059_v43, %v732_v15  ;;  %v1092_v15 = vrot.slane %v1834_v48, %v1091_v13 }
 0x91f   :  { %1067 = vadd.xlane.f32.xlu0 %v1065_v49  ;;  %v1066_v50 = vadd.f32 %v1062_v45, %v733_v16 }
 0x921   :  { %1069 = vadd.xlane.f32.xlu1 %v1066_v50 }
 0x9ac   :  { %v1068_v53 = vpop.xlane.xlu0 %1067 }
 0x9ad   :  { %v1071_v54 = vmul.f32 0.0078125, %v1068_v53 }
 0x9ae   :  { %v1070_v55 = vpop.xlane.xlu1 %1069 }
 0x9af   :  { %v1073_v56 = vsub.f32 %v1065_v49, %v1071_v54  ;;  %v1072_v57 = vmul.f32 0.0078125, %v1070_v55 }
 0x9b1   :  { %v1074_v60 = vsub.f32 %v1066_v50, %v1072_v57  ;;  %v1075_v61 = vmul.f32 %v1073_v56, %v1073_v56 }
 0x9b3   :  { %1077 = vadd.xlane.f32.xlu0 %v1075_v61  ;;  %v1076_v63 = vmul.f32 %v1074_v60, %v1074_v60 }
 0x9b5   :  { %1079 = vadd.xlane.f32.xlu1 %v1076_v63 }
 0xa40   :  { %v1078_v6 = vpop.xlane.xlu0 %1077 }
 0xa41   :  { %v1081_v8 = vmul.f32 0.0078125, %v1078_v6 }
 0xa42   :  { %v1080_v9 = vpop.xlane.xlu1 %1079 }
 0xa43   :  { %v1083_v10 = vadd.f32 1e-05, %v1081_v8  ;;  %v1082_v11 = vmul.f32 0.0078125, %v1080_v9 }
 0xa45   :  { %1576 = vrsqrt.f32 %v1083_v10  ;;  %v1084_v12 = vadd.f32 1e-05, %v1082_v11 }
 0xa47   :  { %1578 = vrsqrt.f32 %v1084_v12 }
 0xa4f   :  { %v1577_v16 = vpop.eup %1576 }
 0xa50   :  { %v1087_v17 = vmul.f32 %v1577_v16, %v1073_v56 }
 0xa51   :  { %v1579_v7 = vpop.eup %1578 }
 0xa52   :  { %v1093_v18 = vmul.f32 %v1092_v15, %v1087_v17  ;;  %v1088_v19 = vmul.f32 %v1579_v7, %v1074_v60 }
 0xa54   :  { %v1094_v20 = vmul.f32 %v1092_v15, %v1088_v19  ;;  %v1099_v21 = vadd.f32 %v1098_v62, %v1093_v18 }
 0xa56   :  { %v1100_v22 = vadd.f32 %v1098_v62, %v1094_v20  ;;  %v1103_v23 = vmul.f32 0.01, %v1099_v21  ;;  %vm1101_vm3 = vcmp.gt.f32.partialorder %v1099_v21, 0.0 }
 0xa58   :  { %vm1102_vm4 = vcmp.gt.f32.partialorder %v1100_v22, 0.0  ;;  %v1104_v24 = vmul.f32 0.01, %v1100_v22  ;;  %v1105_v25 = vsel %vm1101_vm3, %v1099_v21, %v1103_v23 }
 0xa5a   :  { %v1106_v26 = vsel %vm1102_vm4, %v1100_v22, %v1104_v24 }
 0xa5b   :  { %v1107_v27 = vpack.c.bf16 %v1106_v26, %v1105_v25 }
 0xa5d   :  { %1455 = vmatmul.mubr.bf16.vlgmr.msra.gmra.mrb[16].mxu1 %v1107_v27 }
 0xb30   :  { %v1213_v28 = vpop.f32.mrb[16].mxu1 }
 0xb31   :  { %v1214_v48 = vadd.f32 %v1308_v46, %v1213_v28  ;;  %v1456_v29 = vpop.f32.mrb[17].mxu1 }
 0xb32   :  { %v1216_v30 = vpop.f32.mrb[18].mxu1 }
 0xb33   :  { %1220 = vst [vmem:[#allocation10] sm:$0xff] %v1214_v48  ;;  %v1217_v31 = vadd.f32 %v1308_v46, %v1216_v30  ;;  %v1457_v32 = vpop.f32.mrb[19].mxu1 }
 0xb35   :  { %1221 = vst [vmem:[#allocation10 + $0x8] sm:$0xff] %v1217_v31 }
 0xb36   :  { %1679 = shalt.err (!%p1676_p8)
}
 0xb37   :  { %s1680_s12 = scalar_lea.hbm %s1951_s6, 256 }
 0xb38   :  { %p1681_p9 = scmp.ne.s32.totalorder %s1951_s6, %s1680_s12  ;;  %p1684_p10 = scmp.lt.u32.totalorder %s1680_s12, %s1951_s6 }
 0xb3a   :  { %p1686_p11 = pnand %p1684_p10, %p1681_p9 }
 0xb3c   :  { %1689 = shalt.err (!%p1686_p11)
}
 0xb3d   :  { %1233 = dma.vmem_to_hbm [thread:$0]  %s1228_s9, 256, %s1951_s6, [#allocation4], %s1700_s1, %s1700_s1, %s1701_s19  }
 0xb3e   :  { %1696 = dma.done.wait [#allocation4], 256  }
 0xb3f   :  { %1697 = vsyncadd [#allocation4], 4294967040 }
 0xb40   :  { %1237 = vsyncpa [#allocation3], 1 }
 0xb41   :  { %1238 = vsyncpa [#allocation6], 1 }
 0xb42   :  { %1239 = vsyncpa [#allocation9], 1 }
 0xb43   :  { %1240 = vsyncpa [#allocation4], 1 }

</bundles_post_ra>
